<compile_context>
chip_gen: v7x
topology: tpu7x:2x2x1
jax: 0.10.0
libtpu: 0.0.40
codegen_flags: <defaults>
</compile_context>

<pallas_src>
import math
import numpy as np

import jax
import jax.numpy as jnp
from jax import lax
from jax.experimental import pallas as pl
from jax.experimental.pallas import tpu as pltpu


# ---------------------------------------------------------------------------
# Deterministic DCT filter construction (matches get_dct_filter in PyTorch).
# ---------------------------------------------------------------------------
def _build_filter(pos, freq, POS):
    result = math.cos(math.pi * freq * (pos + 0.5) / POS) / math.sqrt(POS)
    if freq == 0:
        return result
    return result * math.sqrt(2)


def get_dct_filter(height, width, mapper_x, mapper_y, channel):
    assert len(mapper_x) == len(mapper_y)
    assert channel % len(mapper_x) == 0
    c_part = channel // len(mapper_x)
    dct_filter = np.zeros((channel, height, width), dtype=np.float32)
    for i, (u_x, v_y) in enumerate(zip(mapper_x, mapper_y)):
        for t_x in range(height):
            for t_y in range(width):
                dct_filter[i * c_part:(i + 1) * c_part, t_x, t_y] = (
                    _build_filter(t_x, u_x, height) * _build_filter(t_y, v_y, width)
                )
    return jnp.asarray(dct_filter)


# ---------------------------------------------------------------------------
# Pallas kernel: elementwise multiply by the DCT filter + spatial reduction.
# Multiply/accumulate is done in 128-lane chunks directly off the refs so the
# only full-precision live temporary is a (TN, TC, 128) f32 accumulator.
# ---------------------------------------------------------------------------
def dct_pool_kernel(x_ref, w_ref, o_ref):
    # x_ref: (TN, TC, HW)  -- TN batch rows x TC channels per grid step
    # w_ref: (TC, HW)      -- DCT filter slice (constant along the inner grid axis)
    # o_ref: (TN, TC)      -- per-(batch, channel) spectral pooling result
    hw = x_ref.shape[-1]

    if hw % 128 == 0 and hw > 128:
        n_chunks = hw // 128
        acc0 = jnp.zeros(x_ref.shape[:-1] + (128,), jnp.float32)

        if n_chunks <= 4:
            # Short fixed trip count: static unrolled chunk MAC (VPU adds only).
            acc = acc0
            for k in range(n_chunks):
                lo = k * 128
                xc = x_ref[:, :, lo:lo + 128].astype(jnp.float32)
                wc = w_ref[:, lo:lo + 128].astype(jnp.float32)
                acc = acc + xc * wc[None, :, :]
        else:
            def chunk_mac(k, acc):
                lo = pl.multiple_of(k * 128, 128)
                xc = x_ref[:, :, pl.ds(lo, 128)].astype(jnp.float32)
                wc = w_ref[:, pl.ds(lo, 128)].astype(jnp.float32)
                return acc + xc * wc[None, :, :]

            acc = lax.fori_loop(0, n_chunks, chunk_mac, acc0, unroll=True)

        # Single 128-lane cross-lane reduce per output row (minimal XLU work).
        o_ref[...] = jnp.sum(acc, axis=-1).astype(o_ref.dtype)
    else:
        # HW not a 128-multiple (e.g. 7x7=49) or exactly one vreg wide: blocks are
        # small in this regime, so a direct product + reduce is fine.
        prod = x_ref[...].astype(jnp.float32) * w_ref[...].astype(jnp.float32)[None, :, :]
        o_ref[...] = jnp.sum(prod, axis=-1).astype(o_ref.dtype)


# ---------------------------------------------------------------------------
# Wrapper: tiling heuristic + pallas_call.
# ---------------------------------------------------------------------------
def _live_vmem_bytes(tn, tc, hw, x_itemsize, w_itemsize):
    """Double-buffered I/O blocks + live f32 chunk temporaries in the body."""
    x_block = tn * tc * hw * x_itemsize
    w_block = tc * hw * w_itemsize
    o_block = tn * tc * x_itemsize
    lane = 128 if (hw % 128 == 0 and hw > 128) else hw
    body_tmp = 4 * tn * tc * lane * 4        # acc + x/w upcast chunk + product (f32)
    return 2 * (x_block + w_block + o_block) + body_tmp


def _choose_tiles(N, C, HW, x_itemsize, w_itemsize):
    """Pick (TN, TC): multi-MiB x blocks, lane/sublane-aligned, within VMEM."""
    X_BLOCK_TARGET = 12 << 20     # per x block (double-buffered -> ~24 MiB)
    W_FULL_BUDGET = 2 << 20       # keep the whole DCT filter resident if it fits
    VMEM_CAP = 44 << 20           # stay under the 48 MiB limit we declare (v7x safe)

    chan_x = HW * x_itemsize      # bytes per (n, c) spatial row of x
    chan_w = HW * w_itemsize

    # --- TC: full C when the filter + an 8-row x block fit, else multiple of 128.
    if C * chan_w <= W_FULL_BUDGET and 8 * C * chan_x <= X_BLOCK_TARGET:
        tc = C
    else:
        tc = (X_BLOCK_TARGET // (8 * chan_x)) // 128 * 128
        tc = max(128, tc)
        tc = min(tc, C)           # if C < 128 this is the full dim (legal)

    # --- TN: fill the x block target; multiple of 8 or the full batch dim.
    tn = X_BLOCK_TARGET // max(1, tc * chan_x)
    tn = min(N, max(8, (tn // 8) * 8))

    # --- Safety: shrink until the declared VMEM budget is respected.
    while _live_vmem_bytes(tn, tc, HW, x_itemsize, w_itemsize) > VMEM_CAP and tn > 8:
        tn = max(8, ((tn // 2) // 8) * 8)
    while _live_vmem_bytes(tn, tc, HW, x_itemsize, w_itemsize) > VMEM_CAP and tc > 128:
        tc = max(128, ((tc // 2) // 128) * 128)

    # --- Best effort: >= 4 total grid steps so each v7x TensorCore pipelines.
    n_c = pl.cdiv(C, tc)
    if n_c * pl.cdiv(N, tn) < 4 and N >= 16:
        want_n_blocks = max(2, pl.cdiv(4, n_c))
        tn_try = max(8, (pl.cdiv(N, want_n_blocks) // 8) * 8)
        tn = min(tn, tn_try)

    return int(tn), int(tc)


def multi_spectral_dct_layer(x, weight):
    """x: (N, C, H, W), weight: (C, H, W) -> (N, C)."""
    assert x.ndim == 4, "x must been 4 dimensions, but got " + str(x.ndim)
    N, C, H, W = x.shape
    assert weight.shape == (C, H, W)
    HW = H * W
    x_flat = x.reshape(N, C, HW)          # free metadata reshape (NCHW contiguous)
    w_flat = weight.reshape(C, HW)

    x_itemsize = jnp.dtype(x.dtype).itemsize
    w_itemsize = jnp.dtype(weight.dtype).itemsize
    TN, TC = _choose_tiles(N, C, HW, x_itemsize, w_itemsize)
    n_c = pl.cdiv(C, TC)
    n_n = pl.cdiv(N, TN)

    # Explicit VMEM limit: double-buffered I/O blocks + live body temporaries,
    # with headroom, clamped well under v7x's 64 MiB physical VMEM.
    vmem_needed = _live_vmem_bytes(TN, TC, HW, x_itemsize, w_itemsize)
    vmem_limit = int(min(max(vmem_needed + (4 << 20), 32 << 20), 48 << 20))

    # Advisory cost: tells XLA this custom call is HBM-bound.
    cost = pl.CostEstimate(
        flops=2 * N * C * HW,
        transcendentals=0,
        bytes_accessed=N * C * HW * x_itemsize + C * HW * w_itemsize + N * C * x_itemsize,
    )

    # C-blocks outer, N-blocks inner: the weight block index is constant along the
    # inner axis, so Pallas does not re-DMA it between inner steps.
    grid = (n_c, n_n)

    return pl.pallas_call(
        dct_pool_kernel,
        out_shape=jax.ShapeDtypeStruct((N, C), x.dtype),
        grid=grid,
        in_specs=[
            pl.BlockSpec((TN, TC, HW), lambda cj, ni: (ni, cj, 0)),
            pl.BlockSpec((TC, HW), lambda cj, ni: (cj, 0)),
        ],
        out_specs=pl.BlockSpec((TN, TC), lambda cj, ni: (ni, cj)),
        compiler_params=pltpu.CompilerParams(
            dimension_semantics=("parallel", "parallel"),
            vmem_limit_bytes=vmem_limit,
        ),
        cost_estimate=cost,
    )(x_flat, w_flat)


# ---------------------------------------------------------------------------
# Main: deterministic small example + pure-JAX reference check.
# ---------------------------------------------------------------------------
if __name__ == "__main__":
    # Small config consistent with the module: channel divisible by num_freq.
    N, C, H, W = 2, 4, 16, 16
    mapper_x = [0, 1]
    mapper_y = [0, 2]

    weight = get_dct_filter(H, W, mapper_x, mapper_y, C)  # (C, H, W)

    key = jax.random.PRNGKey(0)
    x = jax.random.normal(key, (N, C, H, W), dtype=jnp.float32)

    out = multi_spectral_dct_layer(x, weight)
    out = jax.block_until_ready(out)

    # Pure-JAX reference (mirrors the PyTorch forward exactly).
    ref = jnp.sum(x * weight[None], axis=(2, 3))
    ref = jax.block_until_ready(ref)

    assert out.shape == (N, C), out.shape
    np.testing.assert_allclose(np.asarray(out), np.asarray(ref), rtol=1e-5, atol=1e-5)

    print("KERNEL_OK")
</pallas_src>

<mosaic_0001>
module attributes {stable_mosaic.version = 11 : i64} {
  func.func @dct_pool_kernel(%arg0: i32, %arg1: i32, %arg2: memref<2x4x256xf32, #tpu.memory_space<vmem>>, %arg3: memref<4x256xf32, #tpu.memory_space<vmem>>, %arg4: memref<2x4xf32, #tpu.memory_space<vmem>>) attributes {dimension_semantics = [#tpu.dimension_semantics<parallel>, #tpu.dimension_semantics<parallel>], iteration_bounds = array<i64: 1, 1>, scalar_prefetch = 0 : i64, scratch_operands = 0 : i64, tpu.core_type = #tpu.core_type<tc>, window_params = [{transform_indices = @transform_0, window_bounds = array<i64: 2, 4, 256>}, {transform_indices = @transform_1, window_bounds = array<i64: 4, 256>}, {transform_indices = @transform_2, window_bounds = array<i64: 2, 4>}]} {
    %cst = arith.constant 0.000000e+00 : f32
    %0 = vector.broadcast %cst : f32 to vector<2x4x128xf32>
    %c0 = arith.constant 0 : index
    %c0_0 = arith.constant 0 : index
    %c0_1 = arith.constant 0 : index
    %1 = vector.load %arg2[%c0, %c0_0, %c0_1] : memref<2x4x256xf32, #tpu.memory_space<vmem>>, vector<2x4x128xf32>
    %c0_2 = arith.constant 0 : index
    %c0_3 = arith.constant 0 : index
    %2 = vector.load %arg3[%c0_2, %c0_3] : memref<4x256xf32, #tpu.memory_space<vmem>>, vector<4x128xf32>
    %3 = vector.shape_cast %2 : vector<4x128xf32> to vector<1x4x128xf32>
    %4 = vector.broadcast %3 : vector<1x4x128xf32> to vector<2x4x128xf32>
    %5 = arith.mulf %1, %4 : vector<2x4x128xf32>
    %6 = arith.addf %0, %5 : vector<2x4x128xf32>
    %c0_4 = arith.constant 0 : index
    %c0_5 = arith.constant 0 : index
    %c128 = arith.constant 128 : index
    %7 = vector.load %arg2[%c0_4, %c0_5, %c128] : memref<2x4x256xf32, #tpu.memory_space<vmem>>, vector<2x4x128xf32>
    %c0_6 = arith.constant 0 : index
    %c128_7 = arith.constant 128 : index
    %8 = vector.load %arg3[%c0_6, %c128_7] : memref<4x256xf32, #tpu.memory_space<vmem>>, vector<4x128xf32>
    %9 = vector.shape_cast %8 : vector<4x128xf32> to vector<1x4x128xf32>
    %10 = vector.broadcast %9 : vector<1x4x128xf32> to vector<2x4x128xf32>
    %11 = arith.mulf %7, %10 : vector<2x4x128xf32>
    %12 = arith.addf %6, %11 : vector<2x4x128xf32>
    %cst_8 = arith.constant dense<0.000000e+00> : vector<2x4xf32>
    %13 = vector.multi_reduction <add>, %12, %cst_8 [2] : vector<2x4x128xf32> to vector<2x4xf32>
    %c0_9 = arith.constant 0 : index
    %c0_10 = arith.constant 0 : index
    %14 = vector.load %arg4[%c0_9, %c0_10] : memref<2x4xf32, #tpu.memory_space<vmem>>, vector<2x4xf32>
    tpu.vector_store %arg4[%c0_9, %c0_10], %13 {strides = array<i32>} : memref<2x4xf32, #tpu.memory_space<vmem>>, vector<2x4xf32>,
    return
  }
  func.func @transform_0(%arg0: i32, %arg1: i32) -> (i32, i32, i32) {
    %c0_i32 = arith.constant 0 : i32
    %c0_i32_0 = arith.constant 0 : i32
    return %arg1, %arg0, %c0_i32 : i32, i32, i32
  }
  func.func @transform_1(%arg0: i32, %arg1: i32) -> (i32, i32) {
    %c0_i32 = arith.constant 0 : i32
    %c0_i32_0 = arith.constant 0 : i32
    return %arg0, %c0_i32 : i32, i32
  }
  func.func @transform_2(%arg0: i32, %arg1: i32) -> (i32, i32) {
    %c0_i32 = arith.constant 0 : i32
    return %arg1, %arg0 : i32, i32
  }
}

</mosaic_0001>

<bundles_post_ra>
// kernel: tpu_custom_call.1
= control target key start
LH: loop header
LB: loop body
LE: loop exit
PB: predicated region body
PF: predicated region fallthrough
CT: control target
= control target key end

     0   :  { %7 = vsyncpa [#allocation3], 0  ;;  %s225_s0 = inlined_call_operand.hbm [shape: f32[2,4,256], index: 0, kind: input, shape index: {}]   ;;  %s226_s1 = inlined_call_operand.hbm [shape: f32[4,256], index: 1, kind: input, shape index: {}]   ;;  %s227_s2 = inlined_call_operand.hbm [shape: f32[2,4], index: 2, kind: output, shape index: {}]  }
   0x1   :  { %8 = vsyncpa [#allocation6], 0 }
   0x2   :  { %9 = vsyncpa [#allocation4], 0  ;;  %s169_s9 = smov [#allocation2]   ;;  %s97_s13 = scalar_lea.hbm %s225_s0, 256 }
   0x3   :  { %s15_s10 = sshll.u32 %s169_s9, 4  ;;  %p98_p0 = scmp.ne.s32.totalorder %s225_s0, %s97_s13  ;;  %s16_s10 = int_to_ptr.vmem [resolvable:$true] %s15_s10 }
   0x4   :  { %p101_p1 = scmp.lt.u32.totalorder %s97_s13, %s225_s0 }
   0x6   :  { %p103_p2 = pnand %p101_p1, %p98_p0 }
   0x8   :  { %106 = shalt.err (!%p103_p2)
}
   0x9   :  { %s107_s18 = scalar_lea.vmem %s16_s10, 256  ;;  %p112_p4 = scmp.lt.s32.totalorder %s16_s10, %s16_s10 }
   0xa   :  { %p108_p3 = scmp.ne.s32.totalorder %s16_s10, %s107_s18  ;;  %p113_p5 = scmp.lt.s32.totalorder %s107_s18, %s107_s18 }
   0xc   :  { %p114_p6 = por %p113_p5, %p112_p4 }
   0xe   :  { %p115_p7 = pnand %p114_p6, %p108_p3 }
  0x10   :  { %118 = shalt.err (!%p115_p7)
}
  0x11   :  { %s170_s19 = smov 128   ;;  %s171_s20 = smov 8  }
  0x12   :  { %21 = dma.hbm_to_vmem [thread:$0]  %s225_s0, 256, %s16_s10, [#allocation3], %s170_s19, %s170_s19, %s171_s20  }
  0x13   :  { %s172_s23 = smov [#allocation5]   ;;  %s119_s27 = scalar_lea.hbm %s226_s1, 128 }
  0x14   :  { %s28_s24 = sshll.u32 %s172_s23, 4  ;;  %p120_p8 = scmp.ne.s32.totalorder %s226_s1, %s119_s27  ;;  %s29_s24 = int_to_ptr.vmem [resolvable:$true] %s28_s24 }
  0x15   :  { %p123_p9 = scmp.lt.u32.totalorder %s119_s27, %s226_s1 }
  0x17   :  { %p125_p10 = pnand %p123_p9, %p120_p8 }
  0x19   :  { %128 = shalt.err (!%p125_p10)
}
  0x1a   :  { %s129_s4 = scalar_lea.vmem %s29_s24, 128  ;;  %p134_p12 = scmp.lt.s32.totalorder %s29_s24, %s29_s24 }
  0x1b   :  { %p130_p11 = scmp.ne.s32.totalorder %s29_s24, %s129_s4  ;;  %p135_p13 = scmp.lt.s32.totalorder %s129_s4, %s129_s4 }
  0x1d   :  { %p136_p0 = por %p135_p13, %p134_p12 }
  0x1f   :  { %p137_p1 = pnand %p136_p0, %p130_p11 }
  0x21   :  { %140 = shalt.err (!%p137_p1)
}
  0x22   :  { %31 = dma.hbm_to_vmem [thread:$0]  %s226_s1, 128, %s29_s24, [#allocation6]  }
  0x23   :  { %163 = dma.done.wait [#allocation3], 256  }
  0x24   :  { %164 = vsyncadd [#allocation3], 4294967040 }
  0x25   :  { %165 = dma.done.wait [#allocation6], 128  }
  0x26   :  { %166 = vsyncadd [#allocation6], 4294967168  ;;  %v38_v0 = vld [vmem:[#allocation2] sm:$0xf]  ;;  %v40_v1 = vld [vmem:[#allocation5] sm:$0xf]  ;;  %v61_v14 = vlaneseq }
  0x27   :  { %v45_v2 = vld [vmem:[#allocation2 + $0x4] sm:$0xf]  ;;  %v41_v3 = vmul.f32 %v40_v1, %v38_v0  ;;  %v47_v4 = vld [vmem:[#allocation5 + $0x4] sm:$0xf]  ;;  %v39_v5 = vld [vmem:[#allocation2 + $0x8] sm:$0xf] }
  0x28   :  { %v46_v6 = vld [vmem:[#allocation2 + $0xc] sm:$0xf]  ;;  %v48_v7 = vmul.f32 %v47_v4, %v45_v2  ;;  %v42_v8 = vmul.f32 %v40_v1, %v39_v5  ;;  %vm52_vm0 = vcmask 1043456   ;;  %v62_v15 = vand.u32 127, %v61_v14  ;;  %s173_s1 = smov [#allocation7]  }
  0x29   :  { %v49_v9 = vmul.f32 %v47_v4, %v46_v6  ;;  %v64_v16 = vshrl.u32 %v61_v14, 7  ;;  %s82_s6 = sshll.u32 %s173_s1, 4  ;;  %vm71_vm1 = vcmask 1041409   ;;  %vm74_vm2 = vcmask 25600   ;;  %s83_s6 = int_to_ptr.vmem [resolvable:$true] %s82_s6 }
  0x2a   :  { %v50_v10 = vadd.f32 %v48_v7, %v41_v3  ;;  %s141_s7 = scalar_lea.vmem %s83_s6, 32  ;;  %p146_p3 = scmp.lt.s32.totalorder %s83_s6, %s83_s6 }
  0x2b   :  { %v51_v11 = vadd.f32 %v49_v9, %v42_v8  ;;  %v65_v18 = vsub.s32 %v62_v15, %v64_v16  ;;  %p142_p2 = scmp.ne.s32.totalorder %s83_s6, %s141_s7  ;;  %p147_p4 = scmp.lt.s32.totalorder %s141_s7, %s141_s7 }
  0x2c   :  { %v53_v12 = vsel %vm52_vm0, %v50_v10, 0.0 }
  0x2d   :  { %54 = vadd.xlane.f32.xlu0 %v53_v12  ;;  %v56_v13 = vsel %vm52_vm0, %v51_v11, 0.0  ;;  %p148_p5 = por %p147_p4, %p146_p3 }
  0x2f   :  { %p149_p6 = pnand %p148_p5, %p142_p2 }
  0x31   :  { %57 = vadd.xlane.f32.xlu0 %v56_v13 }
  0xba   :  { %v55_v17 = vpop.xlane.xlu0 %54 }
  0xbb   :  { %v66_v20 = vrot.slane %v55_v17, %v65_v18 }
  0xbe   :  { %v58_v19 = vpop.xlane.xlu0 %57 }
  0xbf   :  { %v70_v21 = vrot.slane %v58_v19, %v65_v18 }
  0xc1   :  { %v72_v22 = vsel %vm71_vm1, %v70_v21, %v66_v20 }
  0xc2   :  { %75 = vst.msk [vmem:[#allocation7] sm:$0x3] %vm74_vm2, %v72_v22 }
  0xc3   :  { %152 = shalt.err (!%p149_p6)
}
  0xc4   :  { %s153_s10 = scalar_lea.hbm %s227_s2, 32 }
  0xc5   :  { %p154_p7 = scmp.ne.s32.totalorder %s227_s2, %s153_s10  ;;  %p157_p8 = scmp.lt.u32.totalorder %s153_s10, %s227_s2 }
  0xc7   :  { %p159_p9 = pnand %p157_p8, %p154_p7 }
  0xc9   :  { %162 = shalt.err (!%p159_p9)
}
  0xca   :  { %85 = dma.vmem_to_hbm [thread:$0]  %s83_s6, 32, %s227_s2, [#allocation4]  }
  0xcb   :  { %167 = dma.done.wait [#allocation4], 32  }
  0xcc   :  { %168 = vsyncadd [#allocation4], 4294967264 }
  0xcd   :  { %89 = vsyncpa [#allocation3], 1 }
  0xce   :  { %90 = vsyncpa [#allocation6], 1 }
  0xcf   :  { %91 = vsyncpa [#allocation4], 1 }

</bundles_post_ra>
